<compile_context>
chip_gen: v7x
topology: tpu7x:2x2x1
jax: 0.10.0
libtpu: 0.0.40
codegen_flags: <defaults>
</compile_context>

<pallas_src>
import functools

import jax
import jax.numpy as jnp
from jax.experimental import pallas as pl
from jax.experimental.pallas import tpu as pltpu

NEG_SLOPE = 0.01   # F.leaky_relu default
BN_EPS = 1e-5      # nn.BatchNorm2d default
DROP_P = 0.5       # nn.Dropout(0.5)


def _mix32(idx_u32, seed_u32):
    """Stateless 32-bit mixing hash (lowbias32-style). Pure jnp, so the same
    code runs inside the Pallas kernel and in the plain-JAX reference."""
    h = idx_u32 ^ (seed_u32 * jnp.uint32(0x9E3779B9) + jnp.uint32(0x85EBCA6B))
    h = h ^ (h >> jnp.uint32(16))
    h = h * jnp.uint32(0x7FEB352D)
    h = h ^ (h >> jnp.uint32(15))
    h = h * jnp.uint32(0x846CA68B)
    h = h ^ (h >> jnp.uint32(16))
    return h


def _conv1x1_lrelu(w, x):
    """y = leaky_relu(w @ x) with w:(Cout,Cin), x:(Cin,T).
    For tiny Cin the MXU is mostly fill/drain latency, so use Cin broadcast
    FMAs on the VPU; fall back to the MXU for production-sized channels."""
    cin = x.shape[0]
    if cin >= 64:
        y = jnp.dot(w, x, preferred_element_type=jnp.float32)
    else:
        y = w[:, 0:1] * x[0:1, :]
        for k in range(1, cin):
            y = y + w[:, k:k + 1] * x[k:k + 1, :]
    return jnp.where(y > 0, y, NEG_SLOPE * y)


def gcnn_fused_kernel(seed_ref, x_ref, w_ref, gamma_ref, beta_ref, o_ref,
                      sum_ref, sq_ref, scale_ref, shift_ref,
                      *, hw_total, m_total):
    p = pl.program_id(0)          # 0 = stats pass, 1 = normalize/write pass
    n = pl.program_id(1)          # batch index
    j = pl.program_id(2)          # HW tile index
    last_n = pl.num_programs(1) - 1
    last_j = pl.num_programs(2) - 1

    x = x_ref[0]                  # (Cin, t_hw) f32
    w = w_ref[...]                # (Cout, Cin) f32
    cout, t_hw = w.shape[0], x.shape[1]

    y = _conv1x1_lrelu(w, x)      # (Cout, t_hw)

    @pl.when((p == 0) & (n == 0) & (j == 0))
    def _():
        sum_ref[...] = jnp.zeros_like(sum_ref)
        sq_ref[...] = jnp.zeros_like(sq_ref)

    @pl.when(p == 0)
    def _():
        # Cross-lane reductions ride the XLU slot (free vs the VPU FMAs).
        sum_ref[...] += jnp.sum(y, axis=1, keepdims=True)
        sq_ref[...] += jnp.sum(y * y, axis=1, keepdims=True)

    @pl.when((p == 0) & (n == last_n) & (j == last_j))
    def _():
        # Fold BatchNorm + the dropout keep-scale into one per-channel FMA:
        # out = where(keep, y*scale2 + shift2, 0).
        # NOTE: E[x^2]-E[x]^2 in f32 can cancel for huge M with large |mean|;
        # clamped at 0 and fine at these sizes.
        mean = sum_ref[...] * (1.0 / m_total)
        var = jnp.maximum(sq_ref[...] * (1.0 / m_total) - mean * mean, 0.0)
        inv = jax.lax.rsqrt(var + BN_EPS)
        keep_scale = 1.0 / (1.0 - DROP_P)
        scale = gamma_ref[...] * inv
        scale_ref[...] = scale * keep_scale
        shift_ref[...] = (beta_ref[...] - mean * scale) * keep_scale

    @pl.when(p == 1)
    def _():
        yn = y * scale_ref[...] + shift_ref[...]

        # Dropout(p=0.5): keep-mask from a hash of the global element index,
        # so the mask does not depend on tiling / grid order.
        c_iota = jax.lax.broadcasted_iota(jnp.int32, (cout, t_hw), 0)
        hw_iota = jax.lax.broadcasted_iota(jnp.int32, (cout, t_hw), 1)
        lin = (n * cout + c_iota) * hw_total + (j * t_hw + hw_iota)
        h = _mix32(lin.astype(jnp.uint32), seed_ref[0].astype(jnp.uint32))
        # p = 0.5 exactly -> test the (well-mixed) top bit; for general p use
        # an unsigned threshold compare h < (1-p)*2^32.
        keep = (h & jnp.uint32(0x80000000)) == jnp.uint32(0)
        o_ref[0] = jnp.where(keep, yn, jnp.zeros_like(yn))


def _pick_hw_tile(hw, cap=2048):
    """Largest lane-dense HW tile: whole HW if small, else the biggest
    128-multiple divisor of HW that is <= cap."""
    if hw <= cap:
        return hw
    for t in range(cap - cap % 128, 127, -128):
        if hw % t == 0:
            return t
    return hw


def gcnn_conv_forward(x_nchw, conv_weight, gamma, beta, seed, *, hw_tile=None):
    """conv_weight: (Cout, Cin, 1, 1) as in nn.Conv2d(k=1, bias=False)."""
    N, Cin, H, W = x_nchw.shape
    Cout = conv_weight.shape[0]
    HW = H * W
    t_hw = _pick_hw_tile(HW) if hw_tile is None else hw_tile
    assert HW % t_hw == 0

    x3 = x_nchw.reshape(N, Cin, HW).astype(jnp.float32)
    w = conv_weight.reshape(Cout, Cin).astype(jnp.float32)
    gamma2 = gamma.reshape(Cout, 1).astype(jnp.float32)
    beta2 = beta.reshape(Cout, 1).astype(jnp.float32)
    seed_arr = jnp.asarray([seed], dtype=jnp.int32)

    grid = (2, N, HW // t_hw)     # (pass, batch, hw-tile); pass is slowest

    kernel = functools.partial(gcnn_fused_kernel,
                               hw_total=HW, m_total=float(N * HW))

    out3 = pl.pallas_call(
        kernel,
        out_shape=jax.ShapeDtypeStruct((N, Cout, HW), jnp.float32),
        grid_spec=pltpu.PrefetchScalarGridSpec(
            num_scalar_prefetch=1,
            grid=grid,
            in_specs=[
                pl.BlockSpec((1, Cin, t_hw), lambda p, n, j, s: (n, 0, j)),
                pl.BlockSpec((Cout, Cin), lambda p, n, j, s: (0, 0)),
                pl.BlockSpec((Cout, 1), lambda p, n, j, s: (0, 0)),
                pl.BlockSpec((Cout, 1), lambda p, n, j, s: (0, 0)),
            ],
            # During pass 0 every step maps to block (0,0,0) and the kernel
            # never writes o_ref, so no output writeback happens until pass 1
            # (the first pass-1 step revisits (0,0,0) and overwrites it before
            # the first block change triggers a store).
            out_specs=pl.BlockSpec((1, Cout, t_hw),
                                   lambda p, n, j, s: (p * n, 0, p * j)),
            scratch_shapes=[pltpu.VMEM((Cout, 1), jnp.float32)] * 4,
        ),
        # Stats accumulate across (batch, hw) in pass 0 and are consumed in
        # pass 1 via per-core VMEM scratch, so all axes must stay "arbitrary".
        # TODO(synk): for v7x megacore, emit per-core partial stats so the
        # batch/hw axes could be marked "parallel".
        compiler_params=pltpu.CompilerParams(
            dimension_semantics=("arbitrary", "arbitrary", "arbitrary")),
    )(seed_arr, x3, w, gamma2, beta2)

    return out3.reshape(N, Cout, H, W)


def gcnn_conv_reference(x_nchw, conv_weight, gamma, beta, seed):
    """Plain-JAX reference (same math + same dropout hash)."""
    N, Cin, H, W = x_nchw.shape
    Cout = conv_weight.shape[0]
    HW = H * W
    x3 = x_nchw.reshape(N, Cin, HW).astype(jnp.float32)
    w = conv_weight.reshape(Cout, Cin).astype(jnp.float32)
    y = jnp.einsum('oc,ncs->nos', w, x3)
    y = jnp.where(y > 0, y, NEG_SLOPE * y)
    mean = jnp.mean(y, axis=(0, 2), keepdims=True)
    var = jnp.maximum(jnp.mean(y * y, axis=(0, 2), keepdims=True) - mean * mean,
                      0.0)
    inv = jax.lax.rsqrt(var + BN_EPS)
    scale = gamma.reshape(1, Cout, 1) * inv
    shift = beta.reshape(1, Cout, 1) - mean * scale
    yn = y * scale + shift
    n_i = jnp.arange(N, dtype=jnp.int32)[:, None, None]
    c_i = jnp.arange(Cout, dtype=jnp.int32)[None, :, None]
    s_i = jnp.arange(HW, dtype=jnp.int32)[None, None, :]
    lin = (n_i * Cout + c_i) * HW + s_i
    h = _mix32(lin.astype(jnp.uint32), jnp.uint32(seed))
    keep = (h & jnp.uint32(0x80000000)) == jnp.uint32(0)
    out = jnp.where(keep, yn * (1.0 / (1.0 - DROP_P)), 0.0)
    return out.reshape(N, Cout, H, W)


# TODO(synk): nn.BatchNorm2d running_mean/running_var buffers are not
# produced/updated (forward pass uses batch statistics only, as in training).

if __name__ == "__main__":
    key = jax.random.PRNGKey(0)
    k_x, k_w = jax.random.split(key)

    N, Cin, H, W, Cout = 2, 4, 16, 16, 8

    x = jax.random.normal(k_x, (N, Cin, H, W), dtype=jnp.float32)
    # nn.Conv2d(4, 8, kernel_size=1, bias=False) weight: (Cout, Cin, 1, 1)
    w4 = jax.random.normal(k_w, (Cout, Cin, 1, 1), dtype=jnp.float32) / jnp.sqrt(Cin)
    # nn.BatchNorm2d(Cout) affine init: weight=1, bias=0
    gamma = jnp.ones((Cout,), jnp.float32)
    beta = jnp.zeros((Cout,), jnp.float32)

    out = gcnn_conv_forward(x, w4, gamma, beta, seed=0)
    out = jax.block_until_ready(out)
    assert out.shape == (N, Cout, H, W)
    assert bool(jnp.all(jnp.isfinite(out)))

    ref = gcnn_conv_reference(x, w4, gamma, beta, seed=0)
    assert bool(jnp.allclose(out, ref, rtol=1e-3, atol=1e-3)), \
        float(jnp.max(jnp.abs(out - ref)))
    print("KERNEL_OK")
</pallas_src>

<mosaic_0001>
module attributes {stable_mosaic.version = 11 : i64} {
  func.func @gcnn_fused_kernel(%arg0: i32, %arg1: i32, %arg2: i32, %arg3: memref<1xi32, #tpu.memory_space<smem>>, %arg4: memref<1x4x256xf32, #tpu.memory_space<vmem>>, %arg5: memref<8x4xf32, #tpu.memory_space<vmem>>, %arg6: memref<8x1xf32, #tpu.memory_space<vmem>>, %arg7: memref<8x1xf32, #tpu.memory_space<vmem>>, %arg8: memref<1x8x256xf32, #tpu.memory_space<vmem>>, %arg9: memref<8x1xf32, #tpu.memory_space<vmem>>, %arg10: memref<8x1xf32, #tpu.memory_space<vmem>>, %arg11: memref<8x1xf32, #tpu.memory_space<vmem>>, %arg12: memref<8x1xf32, #tpu.memory_space<vmem>>) attributes {dimension_semantics = [#tpu.dimension_semantics<arbitrary>, #tpu.dimension_semantics<arbitrary>, #tpu.dimension_semantics<arbitrary>], iteration_bounds = array<i64: 2, 2, 1>, scalar_prefetch = 1 : i64, scratch_operands = 4 : i64, tpu.core_type = #tpu.core_type<tc>, window_params = [{transform_indices = @transform_0, window_bounds = array<i64: 1, 4, 256>}, {pipeline_mode = #tpu.pipeline_mode<synchronous>, transform_indices = @transform_1, window_bounds = array<i64: 8, 4>}, {pipeline_mode = #tpu.pipeline_mode<synchronous>, transform_indices = @transform_2, window_bounds = array<i64: 8, 1>}, {pipeline_mode = #tpu.pipeline_mode<synchronous>, transform_indices = @transform_3, window_bounds = array<i64: 8, 1>}, {transform_indices = @transform_4, window_bounds = array<i64: 1, 8, 256>}]} {
    %c0 = arith.constant 0 : index
    %c0_0 = arith.constant 0 : index
    %c0_1 = arith.constant 0 : index
    %0 = vector.load %arg4[%c0, %c0_0, %c0_1] : memref<1x4x256xf32, #tpu.memory_space<vmem>>, vector<1x4x256xf32>
    %1 = vector.shape_cast %0 : vector<1x4x256xf32> to vector<4x256xf32>
    %c0_2 = arith.constant 0 : index
    %c0_3 = arith.constant 0 : index
    %2 = vector.load %arg5[%c0_2, %c0_3] : memref<8x4xf32, #tpu.memory_space<vmem>>, vector<8x4xf32>
    %3 = vector.extract_strided_slice %2 {offsets = [0, 0], sizes = [8, 1], strides = [1, 1]} : vector<8x4xf32> to vector<8x1xf32>
    %4 = vector.extract_strided_slice %1 {offsets = [0, 0], sizes = [1, 256], strides = [1, 1]} : vector<4x256xf32> to vector<1x256xf32>
    %5 = vector.broadcast %3 : vector<8x1xf32> to vector<8x256xf32>
    %6 = vector.broadcast %4 : vector<1x256xf32> to vector<8x256xf32>
    %7 = arith.mulf %5, %6 : vector<8x256xf32>
    %8 = vector.extract_strided_slice %2 {offsets = [0, 1], sizes = [8, 1], strides = [1, 1]} : vector<8x4xf32> to vector<8x1xf32>
    %9 = vector.extract_strided_slice %1 {offsets = [1, 0], sizes = [1, 256], strides = [1, 1]} : vector<4x256xf32> to vector<1x256xf32>
    %10 = vector.broadcast %8 : vector<8x1xf32> to vector<8x256xf32>
    %11 = vector.broadcast %9 : vector<1x256xf32> to vector<8x256xf32>
    %12 = arith.mulf %10, %11 : vector<8x256xf32>
    %13 = arith.addf %7, %12 : vector<8x256xf32>
    %14 = vector.extract_strided_slice %2 {offsets = [0, 2], sizes = [8, 1], strides = [1, 1]} : vector<8x4xf32> to vector<8x1xf32>
    %15 = vector.extract_strided_slice %1 {offsets = [2, 0], sizes = [1, 256], strides = [1, 1]} : vector<4x256xf32> to vector<1x256xf32>
    %16 = vector.broadcast %14 : vector<8x1xf32> to vector<8x256xf32>
    %17 = vector.broadcast %15 : vector<1x256xf32> to vector<8x256xf32>
    %18 = arith.mulf %16, %17 : vector<8x256xf32>
    %19 = arith.addf %13, %18 : vector<8x256xf32>
    %20 = vector.extract_strided_slice %2 {offsets = [0, 3], sizes = [8, 1], strides = [1, 1]} : vector<8x4xf32> to vector<8x1xf32>
    %21 = vector.extract_strided_slice %1 {offsets = [3, 0], sizes = [1, 256], strides = [1, 1]} : vector<4x256xf32> to vector<1x256xf32>
    %22 = vector.broadcast %20 : vector<8x1xf32> to vector<8x256xf32>
    %23 = vector.broadcast %21 : vector<1x256xf32> to vector<8x256xf32>
    %24 = arith.mulf %22, %23 : vector<8x256xf32>
    %25 = arith.addf %19, %24 : vector<8x256xf32>
    %cst = arith.constant 0.000000e+00 : f32
    %26 = vector.broadcast %cst : f32 to vector<8x256xf32>
    %27 = arith.cmpf ogt, %25, %26 : vector<8x256xf32>
    %cst_4 = arith.constant 0.00999999977 : f32
    %28 = vector.broadcast %cst_4 : f32 to vector<8x256xf32>
    %29 = arith.mulf %28, %25 : vector<8x256xf32>
    %30 = arith.select %27, %25, %29 : vector<8x256xi1>, vector<8x256xf32>
    %c0_i32 = arith.constant 0 : i32
    %31 = arith.cmpi eq, %arg0, %c0_i32 : i32
    %c0_i32_5 = arith.constant 0 : i32
    %32 = arith.cmpi eq, %arg1, %c0_i32_5 : i32
    %33 = arith.andi %31, %32 : i1
    %c0_i32_6 = arith.constant 0 : i32
    %34 = arith.cmpi eq, %arg2, %c0_i32_6 : i32
    %35 = arith.andi %33, %34 : i1
    %36 = arith.extui %35 : i1 to i32
    %c0_i32_7 = arith.constant 0 : i32
    %37 = arith.cmpi ne, %36, %c0_i32_7 : i32
    scf.if %37 {
      %cst_15 = arith.constant 0.000000e+00 : f32
      %51 = vector.broadcast %cst_15 : f32 to vector<8x1xf32>
      %c0_16 = arith.constant 0 : index
      %c0_17 = arith.constant 0 : index
      %52 = vector.load %arg9[%c0_16, %c0_17] : memref<8x1xf32, #tpu.memory_space<vmem>>, vector<8x1xf32>
      tpu.vector_store %arg9[%c0_16, %c0_17], %51 {strides = array<i32>} : memref<8x1xf32, #tpu.memory_space<vmem>>, vector<8x1xf32>,
      %cst_18 = arith.constant 0.000000e+00 : f32
      %53 = vector.broadcast %cst_18 : f32 to vector<8x1xf32>
      %c0_19 = arith.constant 0 : index
      %c0_20 = arith.constant 0 : index
      %54 = vector.load %arg10[%c0_19, %c0_20] : memref<8x1xf32, #tpu.memory_space<vmem>>, vector<8x1xf32>
      tpu.vector_store %arg10[%c0_19, %c0_20], %53 {strides = array<i32>} : memref<8x1xf32, #tpu.memory_space<vmem>>, vector<8x1xf32>,
    } else {
    }
    %c0_i32_8 = arith.constant 0 : i32
    %38 = arith.cmpi eq, %arg0, %c0_i32_8 : i32
    %39 = arith.extui %38 : i1 to i32
    %c0_i32_9 = arith.constant 0 : i32
    %40 = arith.cmpi ne, %39, %c0_i32_9 : i32
    scf.if %40 {
      %c0_15 = arith.constant 0 : index
      %c0_16 = arith.constant 0 : index
      %51 = vector.load %arg9[%c0_15, %c0_16] : memref<8x1xf32, #tpu.memory_space<vmem>>, vector<8x1xf32>
      %cst_17 = arith.constant dense<0.000000e+00> : vector<8xf32>
      %52 = vector.multi_reduction <add>, %30, %cst_17 [1] : vector<8x256xf32> to vector<8xf32>
      %53 = vector.shape_cast %52 : vector<8xf32> to vector<8x1xf32>
      %54 = arith.addf %51, %53 : vector<8x1xf32>
      %c0_18 = arith.constant 0 : index
      %c0_19 = arith.constant 0 : index
      %55 = vector.load %arg9[%c0_18, %c0_19] : memref<8x1xf32, #tpu.memory_space<vmem>>, vector<8x1xf32>
      tpu.vector_store %arg9[%c0_18, %c0_19], %54 {strides = array<i32>} : memref<8x1xf32, #tpu.memory_space<vmem>>, vector<8x1xf32>,
      %c0_20 = arith.constant 0 : index
      %c0_21 = arith.constant 0 : index
      %56 = vector.load %arg10[%c0_20, %c0_21] : memref<8x1xf32, #tpu.memory_space<vmem>>, vector<8x1xf32>
      %57 = arith.mulf %30, %30 : vector<8x256xf32>
      %cst_22 = arith.constant dense<0.000000e+00> : vector<8xf32>
      %58 = vector.multi_reduction <add>, %57, %cst_22 [1] : vector<8x256xf32> to vector<8xf32>
      %59 = vector.shape_cast %58 : vector<8xf32> to vector<8x1xf32>
      %60 = arith.addf %56, %59 : vector<8x1xf32>
      %c0_23 = arith.constant 0 : index
      %c0_24 = arith.constant 0 : index
      %61 = vector.load %arg10[%c0_23, %c0_24] : memref<8x1xf32, #tpu.memory_space<vmem>>, vector<8x1xf32>
      tpu.vector_store %arg10[%c0_23, %c0_24], %60 {strides = array<i32>} : memref<8x1xf32, #tpu.memory_space<vmem>>, vector<8x1xf32>,
    } else {
    }
    %c0_i32_10 = arith.constant 0 : i32
    %41 = arith.cmpi eq, %arg0, %c0_i32_10 : i32
    %c1_i32 = arith.constant 1 : i32
    %42 = arith.cmpi eq, %arg1, %c1_i32 : i32
    %43 = arith.andi %41, %42 : i1
    %c0_i32_11 = arith.constant 0 : i32
    %44 = arith.cmpi eq, %arg2, %c0_i32_11 : i32
    %45 = arith.andi %43, %44 : i1
    %46 = arith.extui %45 : i1 to i32
    %c0_i32_12 = arith.constant 0 : i32
    %47 = arith.cmpi ne, %46, %c0_i32_12 : i32
    scf.if %47 {
      %c0_15 = arith.constant 0 : index
      %c0_16 = arith.constant 0 : index
      %51 = vector.load %arg9[%c0_15, %c0_16] : memref<8x1xf32, #tpu.memory_space<vmem>>, vector<8x1xf32>
      %cst_17 = arith.constant 0.001953125 : f32
      %52 = vector.broadcast %cst_17 : f32 to vector<8x1xf32>
      %53 = arith.mulf %51, %52 : vector<8x1xf32>
      %c0_18 = arith.constant 0 : index
      %c0_19 = arith.constant 0 : index
      %54 = vector.load %arg10[%c0_18, %c0_19] : memref<8x1xf32, #tpu.memory_space<vmem>>, vector<8x1xf32>
      %cst_20 = arith.constant 0.001953125 : f32
      %55 = vector.broadcast %cst_20 : f32 to vector<8x1xf32>
      %56 = arith.mulf %54, %55 : vector<8x1xf32>
      %57 = arith.mulf %53, %53 : vector<8x1xf32>
      %58 = arith.subf %56, %57 : vector<8x1xf32>
      %cst_21 = arith.constant 0.000000e+00 : f32
      %59 = vector.broadcast %cst_21 : f32 to vector<8x1xf32>
      %60 = arith.maximumf %58, %59 : vector<8x1xf32>
      %cst_22 = arith.constant 9.99999974E-6 : f32
      %61 = vector.broadcast %cst_22 : f32 to vector<8x1xf32>
      %62 = arith.addf %60, %61 : vector<8x1xf32>
      %63 = math.rsqrt %62 : vector<8x1xf32>
      %c0_23 = arith.constant 0 : index
      %c0_24 = arith.constant 0 : index
      %64 = vector.load %arg6[%c0_23, %c0_24] : memref<8x1xf32, #tpu.memory_space<vmem>>, vector<8x1xf32>
      %65 = arith.mulf %64, %63 : vector<8x1xf32>
      %cst_25 = arith.constant 2.000000e+00 : f32
      %66 = vector.broadcast %cst_25 : f32 to vector<8x1xf32>
      %67 = arith.mulf %65, %66 : vector<8x1xf32>
      %c0_26 = arith.constant 0 : index
      %c0_27 = arith.constant 0 : index
      %68 = vector.load %arg11[%c0_26, %c0_27] : memref<8x1xf32, #tpu.memory_space<vmem>>, vector<8x1xf32>
      tpu.vector_store %arg11[%c0_26, %c0_27], %67 {strides = array<i32>} : memref<8x1xf32, #tpu.memory_space<vmem>>, vector<8x1xf32>,
      %c0_28 = arith.constant 0 : index
      %c0_29 = arith.constant 0 : index
      %69 = vector.load %arg7[%c0_28, %c0_29] : memref<8x1xf32, #tpu.memory_space<vmem>>, vector<8x1xf32>
      %70 = arith.mulf %53, %65 : vector<8x1xf32>
      %71 = arith.subf %69, %70 : vector<8x1xf32>
      %cst_30 = arith.constant 2.000000e+00 : f32
      %72 = vector.broadcast %cst_30 : f32 to vector<8x1xf32>
      %73 = arith.mulf %71, %72 : vector<8x1xf32>
      %c0_31 = arith.constant 0 : index
      %c0_32 = arith.constant 0 : index
      %74 = vector.load %arg12[%c0_31, %c0_32] : memref<8x1xf32, #tpu.memory_space<vmem>>, vector<8x1xf32>
      tpu.vector_store %arg12[%c0_31, %c0_32], %73 {strides = array<i32>} : memref<8x1xf32, #tpu.memory_space<vmem>>, vector<8x1xf32>,
    } else {
    }
    %c1_i32_13 = arith.constant 1 : i32
    %48 = arith.cmpi eq, %arg0, %c1_i32_13 : i32
    %49 = arith.extui %48 : i1 to i32
    %c0_i32_14 = arith.constant 0 : i32
    %50 = arith.cmpi ne, %49, %c0_i32_14 : i32
    scf.if %50 {
      %c0_15 = arith.constant 0 : index
      %c0_16 = arith.constant 0 : index
      %51 = vector.load %arg11[%c0_15, %c0_16] : memref<8x1xf32, #tpu.memory_space<vmem>>, vector<8x1xf32>
      %52 = vector.broadcast %51 : vector<8x1xf32> to vector<8x256xf32>
      %53 = arith.mulf %30, %52 : vector<8x256xf32>
      %c0_17 = arith.constant 0 : index
      %c0_18 = arith.constant 0 : index
      %54 = vector.load %arg12[%c0_17, %c0_18] : memref<8x1xf32, #tpu.memory_space<vmem>>, vector<8x1xf32>
      %55 = vector.broadcast %54 : vector<8x1xf32> to vector<8x256xf32>
      %56 = arith.addf %53, %55 : vector<8x256xf32>
      %57 = tpu.iota {dimensions = array<i32: 0>} : vector<8x256xi32>
      %58 = tpu.iota {dimensions = array<i32: 1>} : vector<8x256xi32>
      %c8_i32 = arith.constant 8 : i32
      %59 = arith.muli %arg1, %c8_i32 : i32
      %60 = vector.broadcast %59 : i32 to vector<8x256xi32>
      %61 = arith.addi %60, %57 : vector<8x256xi32>
      %c256_i32 = arith.constant 256 : i32
      %62 = vector.broadcast %c256_i32 : i32 to vector<8x256xi32>
      %63 = arith.muli %61, %62 : vector<8x256xi32>
      %c256_i32_19 = arith.constant 256 : i32
      %64 = arith.muli %arg2, %c256_i32_19 : i32
      %65 = vector.broadcast %64 : i32 to vector<8x256xi32>
      %66 = arith.addi %65, %58 : vector<8x256xi32>
      %67 = arith.addi %63, %66 : vector<8x256xi32>
      %c0_20 = arith.constant 0 : index
      %68 = memref.load %arg3[%c0_20] : memref<1xi32, #tpu.memory_space<smem>>
      %c-1640531527_i32 = arith.constant -1640531527 : i32
      %69 = arith.muli %68, %c-1640531527_i32 : i32
      %c-2048144789_i32 = arith.constant -2048144789 : i32
      %70 = arith.addi %69, %c-2048144789_i32 : i32
      %71 = vector.broadcast %70 : i32 to vector<8x256xi32>
      %72 = arith.xori %67, %71 : vector<8x256xi32>
      %c16_i32 = arith.constant 16 : i32
      %73 = vector.broadcast %c16_i32 : i32 to vector<8x256xi32>
      %74 = arith.shrui %72, %73 : vector<8x256xi32>
      %75 = arith.xori %72, %74 : vector<8x256xi32>
      %c2146121005_i32 = arith.constant 2146121005 : i32
      %76 = vector.broadcast %c2146121005_i32 : i32 to vector<8x256xi32>
      %77 = arith.muli %75, %76 : vector<8x256xi32>
      %c15_i32 = arith.constant 15 : i32
      %78 = vector.broadcast %c15_i32 : i32 to vector<8x256xi32>
      %79 = arith.shrui %77, %78 : vector<8x256xi32>
      %80 = arith.xori %77, %79 : vector<8x256xi32>
      %c-2073254261_i32 = arith.constant -2073254261 : i32
      %81 = vector.broadcast %c-2073254261_i32 : i32 to vector<8x256xi32>
      %82 = arith.muli %80, %81 : vector<8x256xi32>
      %c16_i32_21 = arith.constant 16 : i32
      %83 = vector.broadcast %c16_i32_21 : i32 to vector<8x256xi32>
      %84 = arith.shrui %82, %83 : vector<8x256xi32>
      %85 = arith.xori %82, %84 : vector<8x256xi32>
      %c-2147483648_i32 = arith.constant -2147483648 : i32
      %86 = vector.broadcast %c-2147483648_i32 : i32 to vector<8x256xi32>
      %87 = arith.andi %85, %86 : vector<8x256xi32>
      %c0_i32_22 = arith.constant 0 : i32
      %88 = vector.broadcast %c0_i32_22 : i32 to vector<8x256xi32>
      %89 = arith.cmpi eq, %87, %88 : vector<8x256xi32>
      %cst_23 = arith.constant 0.000000e+00 : f32
      %90 = vector.broadcast %cst_23 : f32 to vector<8x256xf32>
      %91 = arith.select %89, %56, %90 : vector<8x256xi1>, vector<8x256xf32>
      %c0_24 = arith.constant 0 : index
      %c0_25 = arith.constant 0 : index
      %c0_26 = arith.constant 0 : index
      %92 = vector.load %arg8[%c0_24, %c0_25, %c0_26] : memref<1x8x256xf32, #tpu.memory_space<vmem>>, vector<1x8x256xf32>
      %93 = vector.shape_cast %92 : vector<1x8x256xf32> to vector<8x256xf32>
      %94 = vector.shape_cast %91 : vector<8x256xf32> to vector<1x8x256xf32>
      tpu.vector_store %arg8[%c0_24, %c0_25, %c0_26], %94 {strides = array<i32>} : memref<1x8x256xf32, #tpu.memory_space<vmem>>, vector<1x8x256xf32>,
    } else {
    }
    return
  }
  func.func @transform_0(%arg0: i32, %arg1: i32, %arg2: i32, %arg3: memref<1xi32, #tpu.memory_space<smem>>) -> (i32, i32, i32) {
    %c0_i32 = arith.constant 0 : i32
    %c0_i32_0 = arith.constant 0 : i32
    return %arg1, %c0_i32, %arg2 : i32, i32, i32
  }
  func.func @transform_1(%arg0: i32, %arg1: i32, %arg2: i32, %arg3: memref<1xi32, #tpu.memory_space<smem>>) -> (i32, i32) {
    %c0_i32 = arith.constant 0 : i32
    %c0_i32_0 = arith.constant 0 : i32
    %c0_i32_1 = arith.constant 0 : i32
    return %c0_i32, %c0_i32_0 : i32, i32
  }
  func.func @transform_2(%arg0: i32, %arg1: i32, %arg2: i32, %arg3: memref<1xi32, #tpu.memory_space<smem>>) -> (i32, i32) {
    %c0_i32 = arith.constant 0 : i32
    %c0_i32_0 = arith.constant 0 : i32
    %c0_i32_1 = arith.constant 0 : i32
    return %c0_i32, %c0_i32_0 : i32, i32
  }
  func.func @transform_3(%arg0: i32, %arg1: i32, %arg2: i32, %arg3: memref<1xi32, #tpu.memory_space<smem>>) -> (i32, i32) {
    %c0_i32 = arith.constant 0 : i32
    %c0_i32_0 = arith.constant 0 : i32
    %c0_i32_1 = arith.constant 0 : i32
    return %c0_i32, %c0_i32_0 : i32, i32
  }
  func.func @transform_4(%arg0: i32, %arg1: i32, %arg2: i32, %arg3: memref<1xi32, #tpu.memory_space<smem>>) -> (i32, i32, i32) {
    %0 = arith.muli %arg0, %arg1 : i32
    %1 = arith.muli %arg0, %arg2 : i32
    %c0_i32 = arith.constant 0 : i32
    %c0_i32_0 = arith.constant 0 : i32
    return %0, %c0_i32, %1 : i32, i32, i32
  }
}

</mosaic_0001>

<bundles_post_ra>
// kernel: tpu_custom_call.1
= control target key start
LH: loop header
LB: loop body
LE: loop exit
PB: predicated region body
PF: predicated region fallthrough
CT: control target
= control target key end

     0   :  { %s1007_s0 = inlined_call_operand.<no memory space> [shape: s32[1], index: 0, kind: input, shape index: {}]   ;;  %s1008_s1 = inlined_call_operand.vmem [shape: f32[2,4,256], index: 1, kind: input, shape index: {}]   ;;  %s1009_s2 = inlined_call_operand.vmem [shape: f32[8,4], index: 2, kind: input, shape index: {}]   ;;  %s1010_s3 = inlined_call_operand.vmem [shape: f32[8,1], index: 3, kind: input, shape index: {}]   ;;  %s1011_s4 = inlined_call_operand.vmem [shape: f32[8,1], index: 4, kind: input, shape index: {}]   ;;  %s1012_s5 = inlined_call_operand.hbm [shape: f32[2,8,256], index: 5, kind: output, shape index: {}]  }
   0x1   :  { %10 = sst [smem:[#allocation7]] %s1007_s0 }
   0x2   :  { %11 = vsyncpa [#allocation9], 0 }
   0x3   :  { %13 = vsyncpa [#allocation9 + $0x1], 0  ;;  %s817_s20 = smov 0   ;;  %s819_s21 = smov 0  }
   0x4   :  { %s821_s22 = smov 0   ;;  %s823_s23 = smov 0  }
   0x5   :  { %s825_s24 = smov 0   ;;  %s827_s25 = smov 0  }
   0x6   :  { %s829_s26 = smov 0   ;;  %s831_s27 = smov 0  }
   0x7 LB: > { %s576_s0 = sadd.s32 4294967295, %s775_s27   ;;  %s577_s28 = sadd.s32 4294967294, %s775_s27   ;;  %s775_s27 = sphi %s831_s27, %s19_s27   ;;  %s771_s26 = sphi %s829_s26, %s1022_s26   ;;  %s767_s25 = sphi %s827_s25, %s1021_s25   ;;  %s763_s24 = sphi %s825_s24, %s1020_s24   ;;  %s759_s23 = sphi %s823_s23, %s1019_s23   ;;  %s755_s22 = sphi %s821_s22, %s1018_s22   ;;  %s751_s21 = sphi %s819_s21, %s1017_s21   ;;  %s747_s20 = sphi %s817_s20, %s1016_s20  }
   0x8   : > { %s34_s29 = sadd.s32 1, %s767_s25  ;;  %s38_s30 = sadd.s32 1, %s771_s26 }
   0x9   : > { %p36_p0 = scmp.ge.s32.totalorder %s34_s29, 2  ;;  %s133_s6 = smul.u32 %s767_s25, %s771_s26 }
   0xa   : > { %p152_p1 = scmp.ne.s32.totalorder %s755_s22, %s751_s21  ;;  %p153_p2 = scmp.eq.s32.totalorder %s576_s0, 3 }
   0xb   : > { %s1024_s29 = smov (%p36_p0, %s34_s29), 0  ;;  %s1026_s30 = smov (!%p36_p0, %s38_s30), %s771_s26 }
   0xc   : > { %p158_p3 = scmp.ne.s32.totalorder %s751_s21, %s747_s20  ;;  %p40_p4 = scmp.ge.s32.totalorder %s1026_s30, 2 }
   0xd   : > { %p159_p5 = scmp.eq.s32.totalorder %s577_s28, 3  ;;  %p870_p6 = por %p153_p2, %p152_p1 }
   0xe   : > { %p580_p7 = scmp.ge.s32.totalorder %s775_s27, 1  ;;  %s1028_s30 = smov (%p40_p4, %s1026_s30), 0 }
   0xf   : > { %p877_p8 = por %p159_p5, %p158_p3  ;;  %p199_p9 = scmp.lt.s32.totalorder %s775_s27, 5 }
  0x10   : > { %s135_s9 = smul.u32 %s1028_s30, %s1024_s29  ;;  %s142_s11 = sadd.s32 1, %s755_s22 }
  0x11   : > { %p200_p10 = pnand %p580_p7, %p199_p9 }
  0x12   : > { %s137_s10 = ssub.s32 %s133_s6, %s135_s9  ;;  %v243_v0 = vld [vmem:[%s1009_s2] sm:$0xff] (!%p200_p10)  ;;  %v777_v1 = vmov (!%p200_p10), 0   ;;  %v778_v2 = vmov (!%p200_p10), 2   ;;  %v779_v3 = vmov (!%p200_p10), 1   ;;  %v780_v4 = vmov (!%p200_p10), 3   ;;  %s226_s15 = sand.u32 (!%p200_p10), 1, %s751_s21  }
  0x13   : > { %p140_p11 = scmp.eq.s32.totalorder %s137_s10, 0  ;;  %203 = sbr.rel (%p200_p10) target bundleno = 515 (0x203), region = 36  ;;  %673 = vset.pattern.permute.xlu0 (!%p200_p10), %v777_v1  ;;  %675 = vset.pattern.permute.xlu1 (!%p200_p10), %v778_v2  ;;  %v250_v5 = vlaneseq (!%p200_p10) }
  0x14   : > { %246 = vperm.xlu0 (!%p200_p10), %673, %v243_v0   ;;  %297 = vperm.xlu1 (!%p200_p10), %675, %v243_v0   ;;  %p354_p12 = scmp.eq.s32.totalorder (!%p200_p10), %s763_s24, 0  ;;  %s895_s16 = sshll.u32 (!%p200_p10), %s226_s15, 4 }
  0x15   : > { %s886_s12 = scalar_select %p140_p11, %s755_s22, %s142_s11  }
  0x16   : > { %p355_p13 = scmp.eq.s32.totalorder (!%p200_p10), %s759_s23, 0  ;;  %p230_p1 = scmp.lt.s32.totalorder (!%p200_p10), %s759_s23, 1  ;;  %v907_v6 = vshrl.u32 (!%p200_p10), %v250_v5, 7 }
  0x17   : > { %s925_s9 = scalar_lea.vmem (!%p200_p10), [#allocation8], %s895_s16 }
  0x18   : > { %674 = vset.pattern.permute.xlu0 (!%p200_p10), %v779_v3  ;;  %676 = vset.pattern.permute.xlu1 (!%p200_p10), %v780_v4  ;;  %p900_p0 = pnand (!%p200_p10), %p355_p13, %p354_p12  ;;  %v252_v7 = vsub.s32 (!%p200_p10), 0, %v907_v6  ;;  %v256_v8 = vsub.s32 (!%p200_p10), 4, %v907_v6  ;;  %v276_v9 = vsub.s32 (!%p200_p10), 1, %v907_v6  ;;  %v280_v10 = vsub.s32 (!%p200_p10), 5, %v907_v6 }
  0x19   : > { %271 = vperm.xlu0 (!%p200_p10), %674, %v243_v0   ;;  %323 = vperm.xlu1 (!%p200_p10), %676, %v243_v0   ;;  %v302_v12 = vsub.s32 (!%p200_p10), 2, %v907_v6  ;;  %v306_v13 = vsub.s32 (!%p200_p10), 6, %v907_v6  ;;  %v328_v14 = vsub.s32 (!%p200_p10), 3, %v907_v6  ;;  %v332_v15 = vsub.s32 (!%p200_p10), 7, %v907_v6 }
  0x1a   : > { %s231_s18 = scalar_select %p230_p1, %s759_s23, 1 }
  0x1b   : > { %vm363_vm2 = vcmask (!%p900_p0), 7168   ;;  %v781_v54 = vmov (!%p900_p0), 0.0  }
  0x1c   : > { %s594_s19 = sshll.u32 %s231_s18, 3  ;;  %364 = vst.msk [vmem:[#allocation2] sm:$0xff] (!%p900_p0), %vm363_vm2, %v781_v54  ;;  %365 = vst.msk [vmem:[#allocation3] sm:$0xff] (!%p900_p0), %vm363_vm2, %v781_v54 }
  0x1d   : > { %677 = vset.pattern.permute.xlu0 %v780_v4  ;;  %s237_s6 = scalar_lea.vmem %s1008_s1, %s594_s19 }
  0x1e   : > { %v242_v11 = vld [vmem:[%s237_s6] sm:$0xff] }
  0x1f   : > { %v253_v16 = vrot.slane %v242_v11, %v252_v7  ;;  %v257_v17 = vrot.slane %v242_v11, %v256_v8  ;;  %v277_v18 = vrot.slane %v242_v11, %v276_v9  ;;  %v281_v19 = vrot.slane %v242_v11, %v280_v10 }
  0x20   : > { %v303_v20 = vrot.slane %v242_v11, %v302_v12  ;;  %v307_v21 = vrot.slane %v242_v11, %v306_v13  ;;  %v329_v24 = vrot.slane %v242_v11, %v328_v14  ;;  %v333_v25 = vrot.slane %v242_v11, %v332_v15 }
  0x21   : > { %v263_v26 = vrot.slane %v253_v16, %v252_v7  ;;  %v267_v27 = vrot.slane %v257_v17, %v252_v7  ;;  %v287_v28 = vrot.slane %v277_v18, %v276_v9  ;;  %v291_v29 = vrot.slane %v281_v19, %v276_v9 }
  0x22   : > { %v313_v30 = vrot.slane %v303_v20, %v302_v12  ;;  %v317_v31 = vrot.slane %v307_v21, %v302_v12  ;;  %v339_v32 = vrot.slane %v329_v24, %v328_v14  ;;  %v343_v33 = vrot.slane %v333_v25, %v328_v14 }
  0x93   : > { %v247_v22 = vpop.permute.xlu0 %246  ;;  %v298_v23 = vpop.permute.xlu1 %297 }
  0x94   : > { %v268_v36 = vmul.f32 %v263_v26, %v247_v22  ;;  %v269_v37 = vmul.f32 %v267_v27, %v247_v22  ;;  %v318_v40 = vmul.f32 %v313_v30, %v298_v23  ;;  %v319_v41 = vmul.f32 %v317_v31, %v298_v23 }
  0x98   : > { %v272_v34 = vpop.permute.xlu0 %271  ;;  %v324_v35 = vpop.permute.xlu1 %323 }
  0x99   : > { %v292_v38 = vmul.f32 %v287_v28, %v272_v34  ;;  %v293_v39 = vmul.f32 %v291_v29, %v272_v34  ;;  %v344_v44 = vmul.f32 %v339_v32, %v324_v35  ;;  %v345_v45 = vmul.f32 %v343_v33, %v324_v35 }
  0x9b   : > { %v294_v42 = vadd.f32 %v292_v38, %v268_v36  ;;  %v295_v43 = vadd.f32 %v293_v39, %v269_v37 }
  0x9d   : > { %v320_v46 = vadd.f32 %v318_v40, %v294_v42  ;;  %v321_v47 = vadd.f32 %v319_v41, %v295_v43  ;;  %362 = sbr.rel (%p900_p0) target bundleno = 164 (0xa4), region = 40 }
  0x9f   : > { %v346_v48 = vadd.f32 %v344_v44, %v320_v46  ;;  %v347_v49 = vadd.f32 %v345_v45, %v321_v47 }
  0xa1   : > { %vm348_vm0 = vcmp.gt.f32.partialorder %v346_v48, 0.0  ;;  %vm349_vm1 = vcmp.gt.f32.partialorder %v347_v49, 0.0  ;;  %v350_v50 = vmul.f32 0.01, %v346_v48  ;;  %v351_v51 = vmul.f32 0.01, %v347_v49 }
  0xa3   : > { %v920_v52 = vsel %vm348_vm0, %v346_v48, %v350_v50  ;;  %v922_v53 = vsel %vm349_vm1, %v347_v49, %v351_v51 }
  0xa4 PF: > { %p585_p2 = scmp.ne.s32.totalorder %s763_s24, 0 }
  0xa5   : > { %v370_v55 = vadd.f32 (!%p585_p2), %v922_v53, %v920_v52  ;;  %v377_v56 = vmul.f32 (!%p585_p2), %v920_v52, %v920_v52  ;;  %v378_v57 = vmul.f32 (!%p585_p2), %v922_v53, %v922_v53  ;;  %v369_v59 = vld [vmem:[#allocation2] sm:$0xff] (!%p585_p2)  ;;  %vm374_vm3 = vcmask (!%p585_p2), 7168   ;;  %v376_v62 = vld [vmem:[#allocation3] sm:$0xff] (!%p585_p2) }
  0xa6   : > { %368 = sbr.rel (%p585_p2) target bundleno = 316 (0x13c), region = 44 }
  0xa7   : > { %371 = vadd.xlane.f32.xlu0 (!%p585_p2), %v370_v55  ;;  %v379_v58 = vadd.f32 (!%p585_p2), %v378_v57, %v377_v56 }
  0xab   : > { %380 = vadd.xlane.f32.xlu0 (!%p585_p2), %v379_v58 }
 0x134   : > { %v372_v60 = vpop.xlane.xlu0 %371 }
 0x135   : > { %v373_v61 = vadd.f32 %v372_v60, %v369_v59 }
 0x137   : > { %375 = vst.msk [vmem:[#allocation2] sm:$0xff] %vm374_vm3, %v373_v61 }
 0x138   : > { %v381_v63 = vpop.xlane.xlu0 %380 }
 0x139   : > { %v382_v0 = vadd.f32 %v381_v63, %v376_v62 }
 0x13b   : > { %383 = vst.msk [vmem:[#allocation3] sm:$0xff] %vm374_vm3, %v382_v0 }
 0x13c PF: > { %p384_p3 = scmp.eq.s32.totalorder %s759_s23, 1 }
 0x13e   : > { %p385_p4 = pnand %p384_p3, %p354_p12 }
 0x13f   : > { %v391_v1 = vld [vmem:[#allocation2] sm:$0xff] (!%p385_p4)  ;;  %vm403_vm4 = vcmask (!%p385_p4), 7168  }
 0x140   : > { %390 = sbr.rel (%p385_p4) target bundleno = 351 (0x15f), region = 48  ;;  %v392_v3 = vmul.f32 (!%p385_p4), 0.001953125, %v391_v1  ;;  %v400_v11 = vld [vmem:[%s1010_s3] sm:$0xff] (!%p385_p4) }
 0x141   : > { %v405_v14 = vld [vmem:[%s1011_s4] sm:$0xff] (!%p385_p4) }
 0x142   : > { %v393_v2 = vld [vmem:[#allocation3] sm:$0xff] (!%p385_p4)  ;;  %v395_v7 = vmul.f32 (!%p385_p4), %v392_v3, %v392_v3 }
 0x143   : > { %v394_v4 = vmul.f32 (!%p385_p4), 0.001953125, %v393_v2 }
 0x145   : > { %v396_v8 = vsub.f32 (!%p385_p4), %v394_v4, %v395_v7 }
 0x147   : > { %v397_v9 = vmax.f32 %v396_v8, 0.0 }
 0x149   : > { %v398_v10 = vadd.f32 1e-05, %v397_v9 }
 0x14b   : > { %678 = vrsqrt.f32 %v398_v10 }
 0x155   : > { %v679_v12 = vpop.eup %678 }
 0x156   : > { %v401_v13 = vmul.f32 %v679_v12, %v400_v11 }
 0x158   : > { %v402_v15 = vmul.f32 2.0, %v401_v13  ;;  %v406_v16 = vmul.f32 %v401_v13, %v392_v3 }
 0x15a   : > { %404 = vst.msk [vmem:[#allocation4] sm:$0xff] %vm403_vm4, %v402_v15  ;;  %v407_v17 = vsub.f32 %v405_v14, %v406_v16 }
 0x15c   : > { %v408_v18 = vmul.f32 2.0, %v407_v17 }
 0x15e   : > { %409 = vst.msk [vmem:[#allocation5] sm:$0xff] %vm403_vm4, %v408_v18 }
 0x15f PF: > { %p587_p5 = scmp.ne.s32.totalorder %s763_s24, 1 }
 0x160   : > { %v782_v20 = vmov (!%p587_p5), 0   ;;  %s588_s16 = sshll.u32 (!%p587_p5), %s759_s23, 3  ;;  %s445_s17 = sld [smem:[#allocation7]] (!%p587_p5)  ;;  %v433_v23 = vand.u32 (!%p587_p5), 127, %v250_v5 }
 0x161   : > { %413 = sbr.rel (%p587_p5) target bundleno = 490 (0x1ea), region = 52  ;;  %v414_v19 = vld [vmem:[#allocation4] sm:$0xff] (!%p587_p5)  ;;  %680 = vset.pattern.permute.xlu0 (!%p587_p5), %v782_v20  ;;  %v436_v22 = vstv (!%p587_p5), %s588_s16 }
 0x162   : > { %417 = vperm.xlu0 (!%p587_p5), %680, %v414_v19   ;;  %v437_v24 = vadd.s32 (!%p587_p5), %v436_v22, %v907_v6  ;;  %v434_v25 = vadd.s32 (!%p587_p5), 128, %v433_v23 }
 0x164   : > { %v438_v26 = vmul.u32 (!%p587_p5), 256, %v437_v24 }
 0x165   : > { %v422_v21 = vld [vmem:[#allocation5] sm:$0xff] (!%p587_p5) }
 0x166   : > { %425 = vperm.xlu0 (!%p587_p5), %680, %v422_v21   ;;  %s446_s18 = smul.u32 (!%p587_p5), 2654435769, %s445_s17  ;;  %v443_v27 = vadd.s32 (!%p587_p5), %v438_v26, %v433_v23  ;;  %v444_v28 = vadd.s32 (!%p587_p5), %v438_v26, %v434_v25 }
 0x168   : > { %s447_s19 = sadd.s32 2246822507, %s446_s18 }
 0x169   : > { %v448_v29 = vstv %s447_s19 }
 0x16a   : > { %v449_v30 = vxor.u32 %v448_v29, %v443_v27  ;;  %v450_v31 = vxor.u32 %v448_v29, %v444_v28 }
 0x16c   : > { %v451_v32 = vshrl.u32 %v449_v30, 16  ;;  %v452_v33 = vshrl.u32 %v450_v31, 16 }
 0x16e   : > { %v453_v34 = vxor.u32 %v451_v32, %v449_v30  ;;  %v454_v35 = vxor.u32 %v452_v33, %v450_v31 }
 0x170   : > { %v455_v36 = vmul.u32 2146121005, %v453_v34  ;;  %v456_v37 = vmul.u32 2146121005, %v454_v35 }
 0x172   : > { %v457_v38 = vshrl.u32 %v455_v36, 15  ;;  %v458_v39 = vshrl.u32 %v456_v37, 15 }
 0x174   : > { %v459_v5 = vxor.u32 %v457_v38, %v455_v36  ;;  %v460_v40 = vxor.u32 %v458_v39, %v456_v37 }
 0x176   : > { %v461_v6 = vmul.u32 2221713035, %v459_v5  ;;  %v462_v41 = vmul.u32 2221713035, %v460_v40 }
 0x178   : > { %v463_v42 = vshrl.u32 %v461_v6, 16  ;;  %v464_v43 = vshrl.u32 %v462_v41, 16 }
 0x17a   : > { %v465_v44 = vxor.u32 %v463_v42, %v461_v6  ;;  %v466_v45 = vxor.u32 %v464_v43, %v462_v41 }
 0x17c   : > { %v467_v47 = vand.u32 2147483648, %v465_v44  ;;  %v468_v48 = vand.u32 2147483648, %v466_v45 }
 0x17e   : > { %vm469_vm5 = vcmp.eq.s32.totalorder %v467_v47, 0  ;;  %vm470_vm6 = vcmp.eq.s32.totalorder %v468_v48, 0 }
 0x1e1   : > { %v418_v46 = vpop.permute.xlu0 %417 }
 0x1e2   : > { %v420_v49 = vmul.f32 %v418_v46, %v920_v52  ;;  %v421_v50 = vmul.f32 %v418_v46, %v922_v53 }
 0x1e5   : > { %v426_v51 = vpop.permute.xlu0 %425 }
 0x1e6   : > { %v428_v54 = vadd.f32 %v426_v51, %v420_v49  ;;  %v429_v55 = vadd.f32 %v426_v51, %v421_v50 }
 0x1e8   : > { %v471_v56 = vsel %vm469_vm5, %v428_v54, 0.0  ;;  %v472_v57 = vsel %vm470_vm6, %v429_v55, 0.0 }
 0x1e9   : > { %473 = vst [vmem:[%s925_s9] sm:$0xff] %v471_v56  ;;  %474 = vst [vmem:[%s925_s9 + $0x8] sm:$0xff] %v472_v57 }
 0x1ea PF: > { %s483_s0 = smul.u32 %s759_s23, %s763_s24  ;;  %s494_s28 = sshll.u32 %s925_s9, 4  ;;  %s956_s28 = int_to_ptr.vmem [resolvable:$true] %s494_s28 }
 0x1eb   : > { %s476_s14 = scalar_lea.sflag [#allocation9], %s226_s15  ;;  %s681_s16 = scalar_lea.vmem %s956_s28, 256 }
 0x1ec   : > { %s595_s6 = sshll.u32 %s483_s0, 8  ;;  %p682_p7 = scmp.ne.s32.totalorder %s956_s28, %s681_s16 }
 0x1ed   : > { %s492_s13 = scalar_lea.hbm %s1012_s5, %s595_s6  ;;  %s783_s17 = smov [#allocation8]  }
 0x1ee   : > { %p683_p9 = pnand %p682_p7, %p870_p6  ;;  %s685_s23 = sshll.u32 %s783_s17, 4  ;;  %s686_s23 = int_to_ptr.vmem [resolvable:$false] %s685_s23 }
 0x1ef   : > { %s687_s24 = scalar_lea.vmem %s686_s23, 512  ;;  %p688_p11 = scmp.lt.s32.totalorder %s956_s28, %s686_s23 }
 0x1f0   : > { %p684_p10 = pneg %p683_p9  ;;  %p689_p12 = scmp.lt.s32.totalorder %s687_s24, %s681_s16 }
 0x1f2   : > { %p690_p13 = por %p689_p12, %p688_p11 }
 0x1f4   : > { %p691_p0 = pnand %p690_p13, %p684_p10 }
 0x1f6   : > { %694 = shalt.err (!%p691_p0)
}
 0x1f7   : > { %s695_s9 = scalar_lea.hbm %s492_s13, 256  ;;  %s699_s19 = scalar_lea.hbm %s1012_s5, 512 }
 0x1f8   : > { %p696_p1 = scmp.ne.s32.totalorder %s492_s13, %s695_s9  ;;  %p700_p4 = scmp.lt.u32.totalorder %s492_s13, %s1012_s5 }
 0x1f9   : > { %p701_p5 = scmp.lt.u32.totalorder %s699_s19, %s695_s9  ;;  %p703_p9 = scmp.lt.u32.totalorder %s695_s9, %s492_s13 }
 0x1fa   : > { %p697_p2 = pnand %p696_p1, %p870_p6 }
 0x1fb   : > { %p702_p7 = por %p701_p5, %p700_p4 }
 0x1fc   : > { %p698_p3 = pneg %p697_p2 }
 0x1fd   : > { %p704_p11 = por %p703_p9, %p702_p7 }
 0x1ff   : > { %p705_p10 = pnand %p704_p11, %p698_p3 }
 0x201   : > { %708 = shalt.err (!%p705_p10)
}
 0x202   : > { %596 = dma.vmem_to_hbm [thread:$0]  (%p870_p6), %s956_s28, 256, %s492_s13, %s476_s14  }
 0x203 PF: > { %p602_p12 = scmp.ge.s32.totalorder %s775_s27, 2  ;;  %s506_s10 = sand.u32 1, %s747_s20  }
 0x204   : > { %s507_s11 = scalar_lea.sflag [#allocation9], %s506_s10 }
 0x205   : > { %p599_p13 = pnand %p602_p12, %p877_p8 }
 0x207   : > { %742 = dma.done.wait (!%p599_p13), %s507_s11, 256  }
 0x208   : > { %744 = vsyncadd (!%p599_p13), %s507_s11, 4294967040  ;;  %s19_s27 = sadd.s32 1, %s775_s27   ;;  %s1016_s20 = smov %s751_s21 }
 0x209   : > { %p16_p0 = scmp.ge.s32.totalorder %s19_s27, 6   ;;  %s1017_s21 = smov %s755_s22 }
 0x20a   : > { %s1018_s22 = smov %s886_s12  ;;  %s1019_s23 = smov %s767_s25 }
 0x20b   : > { %s1020_s24 = smov %s771_s26  ;;  %s1021_s25 = smov %s1024_s29 }
 0x20c   : > { %s1022_s26 = smov %s1028_s30  ;;  %18 = sbr.rel (!%p16_p0) target bundleno = 7 (0x7), region = 87 }
 0x213   :  { %512 = vsyncpa [#allocation9], 1 }
 0x214   :  { %514 = vsyncpa [#allocation9 + $0x1], 1 }

</bundles_post_ra>
